<compile_context>
chip_gen: v6e
topology: v6e:2x2x1
jax: 0.10.0
libtpu: 0.0.40
codegen_flags: <defaults>
</compile_context>

<pallas_src>
import jax
import jax.numpy as jnp
from jax.experimental import pallas as pl
from jax.experimental.pallas import tpu as pltpu


def _round_up(x, m):
    return (x + m - 1) // m * m


def _cdiv(a, b):
    return -(-a // b)


def _tile_budget():
    """Returns (max lane-tile, VMEM byte budget for double-buffered inputs).

    Scaled per TPU generation so each grid step moves enough HBM bytes to
    amortize the ~0.35 us fixed per-step pipeline overhead while staying
    inside the default scoped-VMEM limit (16 MiB on v5e, 32 MiB on v6e/v7x).
    """
    kind = ""
    try:
        kind = jax.devices()[0].device_kind.lower()
    except Exception:
        pass
    if "v7" in kind:
        return 32768, 24 * 1024 * 1024   # ~3.2 TB/s HBM -> ~25K+ lanes per step
    if "v6" in kind:
        return 16384, 24 * 1024 * 1024   # ~1.4 TB/s
    return 8192, 10 * 1024 * 1024        # v5e / unknown: 16 MiB scoped default


def _puremf_kernel(x_ref, o_ref):
    # x_ref: (2, D, TB) tile in VMEM; [0]=user rows, [1]=item rows,
    #        latent dim D on sublanes, batch on the 128-lane axis.
    # o_ref: (1, TB) f32 lane-dense output row.
    u = x_ref[0].astype(jnp.float32)              # (D, TB)
    i = x_ref[1].astype(jnp.float32)              # (D, TB)
    s = jnp.sum(u * i, axis=0, keepdims=True)     # sublane reduce -> (1, TB)
    o_ref[...] = jax.nn.sigmoid(s)                # EUP transcendental


@jax.jit
def _puremf_forward_pallas(user_table, item_table, users, items):
    """Pallas path: tiled mul + reduce + sigmoid over the batch lanes."""
    users = users.astype(jnp.int32)
    items = items.astype(jnp.int32)

    B = users.shape[0]
    D = user_table.shape[1]
    emb_dtype = jnp.promote_types(user_table.dtype, item_table.dtype)

    # Tile sizing: respect the generation lane cap AND a VMEM byte budget for
    # the double-buffered stacked input (2 bufs * 2 tables * D * TB * itemsize).
    lane_cap, vmem_budget = _tile_budget()
    itemsize = jnp.dtype(emb_dtype).itemsize
    tb_vmem = max(128, (vmem_budget // (2 * 2 * D * itemsize)) // 128 * 128)
    tb_max = max(128, min(lane_cap, tb_vmem))

    # Pad B only to 128 lanes, then pick a tile that divides the padded batch
    # evenly (waste <= 128 lanes per tile instead of up to a whole tile).
    B128 = _round_up(B, 128)
    n_tiles = _cdiv(B128, tb_max)
    TB = _round_up(_cdiv(B128, n_tiles), 128)
    B_pad = TB * n_tiles

    # Fold the pad into the index vectors (id 0); padded lanes are sliced off.
    pad = B_pad - B
    users_p = jnp.pad(users, (0, pad))
    items_p = jnp.pad(items, (0, pad))

    # Row-gather from the (N, D) tables (no per-call full-table transpose),
    # then transpose only the small gathered slab into the (2, D, B_pad)
    # kernel layout. One stacked input -> one DMA per grid step.
    u_emb = jnp.take(user_table, users_p, axis=0).astype(emb_dtype)  # (B_pad, D)
    i_emb = jnp.take(item_table, items_p, axis=0).astype(emb_dtype)  # (B_pad, D)
    x = jnp.transpose(jnp.stack([u_emb, i_emb], axis=0), (0, 2, 1))  # (2, D, B_pad)

    out = pl.pallas_call(
        _puremf_kernel,
        out_shape=jax.ShapeDtypeStruct((1, B_pad), jnp.float32),
        grid_spec=pltpu.PrefetchScalarGridSpec(
            num_scalar_prefetch=0,
            grid=(n_tiles,),
            in_specs=[
                pl.BlockSpec((2, D, TB), lambda b: (0, 0, b)),
            ],
            out_specs=pl.BlockSpec((1, TB), lambda b: (0, b)),
        ),
        compiler_params=pltpu.CompilerParams(
            # Batch tiles are independent -> shard across TensorCores on v7x.
            dimension_semantics=("parallel",),
        ),
    )(x)

    return out[0, :B]                              # (B,) f32


@jax.jit
def _puremf_forward_xla(user_table, item_table, users, items):
    """Small-problem fast path: XLA fuses gather + mul + sum + sigmoid."""
    u = jnp.take(user_table, users.astype(jnp.int32), axis=0)
    i = jnp.take(item_table, items.astype(jnp.int32), axis=0)
    return jax.nn.sigmoid(jnp.sum((u * i).astype(jnp.float32), axis=1))


# Below this batch size, pallas_call launch + padding overhead dominates and
# the fused pure-XLA expression is strictly faster.
_SMALL_BATCH_THRESHOLD = 2048


def puremf_forward(user_table, item_table, users, items, *, force_pallas=False):
    """PureMF.forward: sigmoid(sum(E_u[users] * E_i[items], axis=1)).

    user_table: (num_users, D), item_table: (num_items, D)
    users, items: (B,) integer ids.  Returns (B,) f32.
    """
    if not force_pallas and users.shape[0] < _SMALL_BATCH_THRESHOLD:
        return _puremf_forward_xla(user_table, item_table, users, items)
    return _puremf_forward_pallas(user_table, item_table, users, items)


if __name__ == "__main__":
    # Deterministic synthetic parameters matching PureMF.__init_weight
    # (embedding weights ~ N(0, 1)).  Small shapes; batch deliberately not a
    # multiple of 128 to exercise the padding path.
    num_users = 64
    num_items = 128
    latent_dim = 32          # config['latent_dim_rec']
    batch = 200

    key = jax.random.PRNGKey(0)
    k_u, k_i, k_uid, k_iid = jax.random.split(key, 4)
    user_table = jax.random.normal(k_u, (num_users, latent_dim), jnp.float32)
    item_table = jax.random.normal(k_i, (num_items, latent_dim), jnp.float32)
    users = jax.random.randint(k_uid, (batch,), 0, num_users, jnp.int32)
    items = jax.random.randint(k_iid, (batch,), 0, num_items, jnp.int32)

    # Force the Pallas path so the kernel itself is exercised even though the
    # test batch is below the small-problem threshold.
    out = puremf_forward(user_table, item_table, users, items,
                         force_pallas=True)
    jax.block_until_ready(out)

    # Pure-JAX reference check.
    ref = jax.nn.sigmoid(
        jnp.sum(user_table[users] * item_table[items], axis=1))
    assert out.shape == (batch,)
    assert jnp.allclose(out, ref, atol=1e-5, rtol=1e-5)

    # Also check the small-batch fast path agrees.
    out_small = puremf_forward(user_table, item_table, users, items)
    jax.block_until_ready(out_small)
    assert jnp.allclose(out_small, ref, atol=1e-5, rtol=1e-5)

    print("KERNEL_OK")
</pallas_src>

<mosaic_0001>
module attributes {stable_mosaic.version = 11 : i64} {
  func.func @_puremf_kernel(%arg0: i32, %arg1: memref<2x32x256xf32, #tpu.memory_space<vmem>>, %arg2: memref<1x256xf32, #tpu.memory_space<vmem>>) attributes {dimension_semantics = [#tpu.dimension_semantics<parallel>], iteration_bounds = array<i64: 1>, scalar_prefetch = 0 : i64, scratch_operands = 0 : i64, tpu.core_type = #tpu.core_type<tc>, window_params = [{transform_indices = @transform_0, window_bounds = array<i64: 2, 32, 256>}, {transform_indices = @transform_1, window_bounds = array<i64: 1, 256>}]} {
    %c0 = arith.constant 0 : index
    %c0_0 = arith.constant 0 : index
    %c0_1 = arith.constant 0 : index
    %0 = vector.load %arg1[%c0, %c0_0, %c0_1] : memref<2x32x256xf32, #tpu.memory_space<vmem>>, vector<1x32x256xf32>
    %1 = vector.shape_cast %0 : vector<1x32x256xf32> to vector<32x256xf32>
    %c1 = arith.constant 1 : index
    %c0_2 = arith.constant 0 : index
    %c0_3 = arith.constant 0 : index
    %2 = vector.load %arg1[%c1, %c0_2, %c0_3] : memref<2x32x256xf32, #tpu.memory_space<vmem>>, vector<1x32x256xf32>
    %3 = vector.shape_cast %2 : vector<1x32x256xf32> to vector<32x256xf32>
    %4 = arith.mulf %1, %3 : vector<32x256xf32>
    %cst = arith.constant dense<0.000000e+00> : vector<256xf32>
    %5 = vector.multi_reduction <add>, %4, %cst [0] : vector<32x256xf32> to vector<256xf32>
    %6 = vector.shape_cast %5 : vector<256xf32> to vector<1x256xf32>
    %7 = arith.negf %6 : vector<1x256xf32>
    %8 = math.exp %7 : vector<1x256xf32>
    %cst_4 = arith.constant 1.000000e+00 : f32
    %9 = vector.broadcast %cst_4 : f32 to vector<1x256xf32>
    %10 = arith.addf %9, %8 : vector<1x256xf32>
    %11 = arith.divf %9, %10 : vector<1x256xf32>
    %c0_5 = arith.constant 0 : index
    %c0_6 = arith.constant 0 : index
    %12 = vector.load %arg2[%c0_5, %c0_6] : memref<1x256xf32, #tpu.memory_space<vmem>>, vector<1x256xf32>
    tpu.vector_store %arg2[%c0_5, %c0_6], %11 {strides = array<i32>} : memref<1x256xf32, #tpu.memory_space<vmem>>, vector<1x256xf32>,
    return
  }
  func.func @transform_0(%arg0: i32) -> (i32, i32, i32) {
    %c0_i32 = arith.constant 0 : i32
    %c0_i32_0 = arith.constant 0 : i32
    %c0_i32_1 = arith.constant 0 : i32
    return %c0_i32, %c0_i32_0, %arg0 : i32, i32, i32
  }
  func.func @transform_1(%arg0: i32) -> (i32, i32) {
    %c0_i32 = arith.constant 0 : i32
    %c0_i32_0 = arith.constant 0 : i32
    return %c0_i32, %arg0 : i32, i32
  }
}

</mosaic_0001>

<bundles_post_ra>
// kernel: _puremf_forward_pallas.1
= control target key start
LH: loop header
LB: loop body
LE: loop exit
PB: predicated region body
PF: predicated region fallthrough
CT: control target
= control target key end

     0   :  { %s206_s0 = inlined_call_operand.vmem [shape: f32[2,32,256], index: 0, kind: input, shape index: {}]   ;;  %s207_s1 = inlined_call_operand.hbm [shape: f32[1,256], index: 1, kind: output, shape index: {}]  }
   0x1   :  { %v9_v0 = vld [vmem:[%s206_s0] sm:$0xff]  ;;  %v10_v1 = vld [vmem:[%s206_s0 + $0x8] sm:$0xff]  ;;  %v11_v2 = vld [vmem:[%s206_s0 + $0x10] sm:$0xff] }
   0x2   :  { %v12_v3 = vld [vmem:[%s206_s0 + $0x18] sm:$0xff]  ;;  %v13_v4 = vld [vmem:[%s206_s0 + $0x20] sm:$0xff]  ;;  %v14_v5 = vld [vmem:[%s206_s0 + $0x28] sm:$0xff] }
   0x3   :  { %v15_v6 = vld [vmem:[%s206_s0 + $0x30] sm:$0xff]  ;;  %v16_v7 = vld [vmem:[%s206_s0 + $0x38] sm:$0xff]  ;;  %v101_v8 = vld [vmem:[%s206_s0 + $0x40] sm:$0xff] }
   0x4   :  { %v102_v9 = vld [vmem:[%s206_s0 + $0x48] sm:$0xff]  ;;  %v103_v10 = vld [vmem:[%s206_s0 + $0x50] sm:$0xff]  ;;  %v104_v11 = vld [vmem:[%s206_s0 + $0x58] sm:$0xff]  ;;  %v26_v12 = vmul.f32 %v101_v8, %v9_v0 }
   0x5   :  { %v105_v13 = vld [vmem:[%s206_s0 + $0x60] sm:$0xff]  ;;  %v106_v14 = vld [vmem:[%s206_s0 + $0x68] sm:$0xff]  ;;  %v107_v15 = vld [vmem:[%s206_s0 + $0x70] sm:$0xff]  ;;  %v27_v16 = vmul.f32 %v102_v9, %v10_v1  ;;  %v28_v17 = vmul.f32 %v103_v10, %v11_v2  ;;  %v29_v18 = vmul.f32 %v104_v11, %v12_v3 }
   0x6   :  { %v108_v19 = vld [vmem:[%s206_s0 + $0x78] sm:$0xff]  ;;  %v30_v20 = vmul.f32 %v105_v13, %v13_v4  ;;  %v31_v21 = vmul.f32 %v106_v14, %v14_v5 }
   0x7   :  { %6 = vsyncpa [#allocation3], 0  ;;  %v32_v22 = vmul.f32 %v107_v15, %v15_v6  ;;  %v33_v23 = vmul.f32 %v108_v19, %v16_v7  ;;  %v34_v24 = vadd.f32 %v28_v17, %v26_v12  ;;  %v43_v25 = vadd.f32 %v29_v18, %v27_v16  ;;  %s144_s0 = smov [#allocation2]  }
   0x8   :  { %v143_v48 = vmov 1966171168   ;;  %v70_v50 = vlaneseq  ;;  %s93_s9 = sshll.u32 %s144_s0, 4  ;;  %s94_s9 = int_to_ptr.vmem [resolvable:$true] %s93_s9 }
   0x9   :  { %v35_v26 = vadd.f32 %v34_v24, %v30_v20  ;;  %v44_v27 = vadd.f32 %v43_v25, %v31_v21  ;;  %v68_v49 = vunpack.c.l.s4 %v143_v48  ;;  %s121_s10 = scalar_lea.vmem %s94_s9, 32  ;;  %p126_p1 = scmp.lt.s32.totalorder %s94_s9, %s94_s9 }
   0xa   :  { %v71_v52 = vshrl.u32 %v70_v50, 7  ;;  %vm84_vm0 = vcmp.lt.s32.totalorder %v70_v50, 256  ;;  %p122_p0 = scmp.ne.s32.totalorder %s94_s9, %s121_s10  ;;  %p127_p2 = scmp.lt.s32.totalorder %s121_s10, %s121_s10 }
   0xb   :  { %v36_v28 = vadd.f32 %v35_v26, %v32_v22  ;;  %v45_v29 = vadd.f32 %v44_v27, %v33_v23  ;;  %v69_v51 = vunpack.c.0.s8 %v68_v49 }
   0xc   :  { %p128_p3 = por %p127_p2, %p126_p1 }
   0xd   :  { %v37_v30 = vrot.slane %v36_v28, 4  ;;  %v46_v31 = vrot.slane %v45_v29, 4  ;;  %v72_v54 = vsub.s32 %v69_v51, %v71_v52 }
   0xe   :  { %p129_p4 = pnand %p128_p3, %p122_p0 }
   0xf   :  { %v38_v32 = vadd.f32 %v37_v30, %v36_v28  ;;  %v47_v33 = vadd.f32 %v46_v31, %v45_v29 }
  0x11   :  { %v39_v34 = vrot.slane %v38_v32, 2  ;;  %v48_v35 = vrot.slane %v47_v33, 2 }
  0x13   :  { %v40_v36 = vadd.f32 %v39_v34, %v38_v32  ;;  %v49_v37 = vadd.f32 %v48_v35, %v47_v33 }
  0x15   :  { %v41_v38 = vrot.slane %v40_v36, 1  ;;  %v50_v39 = vrot.slane %v49_v37, 1 }
  0x17   :  { %v42_v40 = vadd.f32 %v41_v38, %v40_v36  ;;  %v51_v41 = vadd.f32 %v50_v39, %v49_v37 }
  0x19   :  { %v109_v42 = vmul.f32 -1.442695, %v42_v40  ;;  %v110_v43 = vmul.f32 -1.442695, %v51_v41 }
  0x1b   :  { %113 = vpow2.f32 %v109_v42 }
  0x1c   :  { %115 = vpow2.f32 %v110_v43 }
  0x28   :  { %v114_v44 = vpop.eup %113 }
  0x29   :  { %v116_v45 = vpop.eup %115  ;;  %v58_v46 = vadd.f32 1.0, %v114_v44 }
  0x2a   :  { %v59_v47 = vadd.f32 1.0, %v116_v45 }
  0x2b   :  { %117 = vrcp.f32 %v58_v46 }
  0x2c   :  { %119 = vrcp.f32 %v59_v47 }
  0x38   :  { %v118_v53 = vpop.eup %117 }
  0x39   :  { %v120_v55 = vpop.eup %119 }
  0x3a   :  { %v66_v56 = vcombine.low %v118_v53, %v120_v55 }
  0x3c   :  { %v73_v57 = vrot.slane %v66_v56, %v72_v54 }
  0x3e   :  { %v80_v58 = vrot.slane %v73_v57, %v72_v54 }
  0x40   :  { %86 = vst.msk [vmem:[#allocation2] sm:$0x3] %vm84_vm0, %v80_v58 }
  0x41   :  { %132 = shalt.err (!%p129_p4)
}
  0x42   :  { %96 = dma.vmem_to_hbm [thread:$0]  %s94_s9, 32, %s207_s1, [#allocation3]  }
  0x43   :  { %141 = dma.done.wait [#allocation3], 32  }
  0x44   :  { %142 = vsyncadd [#allocation3], 4294967264 }
  0x45   :  { %100 = vsyncpa [#allocation3], 1 }

</bundles_post_ra>
